<compile_context>
chip_gen: v5e
topology: v5e:2x2
jax: 0.10.0
libtpu: 0.0.40
codegen_flags: <defaults>
</compile_context>

<pallas_src>
import functools

import jax
import jax.numpy as jnp
from jax.experimental import pallas as pl
from jax.experimental.pallas import tpu as pltpu

_TM_MATMUL = 512            # max rows per matmul tile (safe on v5e/v6e/v7x VMEM)
_TM_ADD = 1024              # max rows per elementwise tile
_VMEM_LIMIT = 32 * 1024 * 1024


def _round_up(x, m):
    return (x + m - 1) // m * m


# ---------------------------------------------------------------------------
# Pallas kernels
# ---------------------------------------------------------------------------
def _matmul_bias_kernel(a_ref, w_ref, b_ref, o_ref, *, relu):
    # a_ref: (tm, K) bf16, w_ref: (K, N) bf16, b_ref: (1, N) f32, o_ref: (tm, N) f32
    acc = jnp.dot(a_ref[...], w_ref[...], preferred_element_type=jnp.float32)
    acc = acc + b_ref[...]
    if relu:
        acc = jnp.maximum(acc, 0.0)
    o_ref[...] = acc.astype(o_ref.dtype)


def _add_kernel(x_ref, y_ref, o_ref):
    o_ref[...] = x_ref[...] + y_ref[...]


def pallas_matmul_bias(a, w_bf16, b_row, relu=False):
    """out = relu?(a @ w + b).  a:(M,K)  w:(K,N) bf16  b:(1,N) f32 -> (M,N) f32.

    M is tiled with a parallel grid; K and N blocks cover the full (small)
    extents, so no K/N padding copies are materialized.  Only the M remainder
    is padded (cheaply) up to the tile size.
    """
    M, K = a.shape
    K2, N = w_bf16.shape
    assert K == K2 and b_row.shape == (1, N)

    tm = min(_TM_MATMUL, _round_up(M, 16))   # 16: bf16 sublane packing
    Mp = _round_up(M, tm)

    a = a.astype(jnp.bfloat16)
    if Mp != M:
        a = jnp.pad(a, ((0, Mp - M), (0, 0)))

    cost = pl.CostEstimate(
        flops=2 * Mp * K * N,
        transcendentals=0,
        bytes_accessed=Mp * K * 2 + K * N * 2 + N * 4 + Mp * N * 4,
    )
    out = pl.pallas_call(
        functools.partial(_matmul_bias_kernel, relu=relu),
        out_shape=jax.ShapeDtypeStruct((Mp, N), jnp.float32),
        grid=(Mp // tm,),
        in_specs=[
            pl.BlockSpec((tm, K), lambda i: (i, 0)),
            pl.BlockSpec((K, N), lambda i: (0, 0)),   # weights resident across grid
            pl.BlockSpec((1, N), lambda i: (0, 0)),
        ],
        out_specs=pl.BlockSpec((tm, N), lambda i: (i, 0)),
        compiler_params=pltpu.CompilerParams(
            dimension_semantics=("parallel",),
            vmem_limit_bytes=_VMEM_LIMIT),
        cost_estimate=cost,
    )(a, w_bf16, b_row)
    if Mp != M:
        out = out[:M]
    return out


def pallas_add(x, y):
    """Elementwise add of two feature maps, lane-dense tiling (no C padding)."""
    shape = x.shape
    total = x.size
    # Present a lane-dense (…,128) view whenever possible (unmasked vst);
    # fall back to the channel dim (full-extent block) otherwise.
    lane = 128 if total % 128 == 0 else shape[-1]
    x2 = x.reshape(-1, lane)
    y2 = y.reshape(-1, lane)
    M = x2.shape[0]

    tm = min(_TM_ADD, _round_up(M, 8))
    Mp = _round_up(M, tm)
    if Mp != M:
        x2 = jnp.pad(x2, ((0, Mp - M), (0, 0)))
        y2 = jnp.pad(y2, ((0, Mp - M), (0, 0)))

    out = pl.pallas_call(
        _add_kernel,
        out_shape=jax.ShapeDtypeStruct((Mp, lane), x.dtype),
        grid=(Mp // tm,),
        in_specs=[
            pl.BlockSpec((tm, lane), lambda i: (i, 0)),
            pl.BlockSpec((tm, lane), lambda i: (i, 0)),
        ],
        out_specs=pl.BlockSpec((tm, lane), lambda i: (i, 0)),
        compiler_params=pltpu.CompilerParams(
            dimension_semantics=("parallel",),
            vmem_limit_bytes=_VMEM_LIMIT),
        cost_estimate=pl.CostEstimate(
            flops=Mp * lane, transcendentals=0,
            bytes_accessed=3 * Mp * lane * 4),
    )(x2, y2)
    if Mp != M:
        out = out[:M]
    return out.reshape(shape)


# ---------------------------------------------------------------------------
# Conv = im2col (JAX glue) + Pallas matmul
# ---------------------------------------------------------------------------
def _im2col(x, kh, kw, stride, padding):
    # x: NHWC
    N, H, W, C = x.shape
    if padding:
        x = jnp.pad(x, ((0, 0), (padding, padding), (padding, padding), (0, 0)))
    Ho = (H + 2 * padding - kh) // stride + 1
    Wo = (W + 2 * padding - kw) // stride + 1
    if kh == 1 and kw == 1 and stride == 1:
        return x, Ho, Wo                      # 1x1 conv: no window extraction
    cols = []
    for i in range(kh):
        for j in range(kw):
            cols.append(x[:, i:i + stride * Ho:stride, j:j + stride * Wo:stride, :])
    return jnp.concatenate(cols, axis=-1), Ho, Wo   # (N,Ho,Wo, kh*kw*C)


def conv2d(x_nhwc, w_mat, b_row, kh, kw, stride, padding, relu):
    # w_mat: (kh*kw*Cin, Cout) bf16 (pre-reshaped at init); b_row: (1, Cout) f32
    Nb, _, _, Cin = x_nhwc.shape
    cols, Ho, Wo = _im2col(x_nhwc, kh, kw, stride, padding)
    a = cols.reshape(Nb * Ho * Wo, kh * kw * Cin)
    out = pallas_matmul_bias(a, w_mat, b_row, relu=relu)
    return out.reshape(Nb, Ho, Wo, w_mat.shape[1])


def upsample2x(x):
    # nearest-neighbor 2x upsample (NHWC)
    return jnp.repeat(jnp.repeat(x, 2, axis=1), 2, axis=2)


# ---------------------------------------------------------------------------
# Parameters (deterministic synthetic init — no checkpoint load)
# ---------------------------------------------------------------------------
def init_params(key, cin=4, fpn_dim=32):
    chans = [8, 16, 32, 64]  # stem, stage1, stage2, stage3 output channels

    def conv_init(k, cout, cin_, kh, kw):
        kw_, kb_ = jax.random.split(k)
        fan_in = cin_ * kh * kw
        scale = 1.0 / jnp.sqrt(fan_in)
        w = jax.random.normal(kw_, (cout, cin_, kh, kw), jnp.float32) * scale
        b = jax.random.normal(kb_, (cout,), jnp.float32) * 0.01
        # Hoist the weight relayout out of the forward path:
        # (Cout,Cin,kh,kw) -> (kh,kw,Cin,Cout) -> (kh*kw*Cin, Cout), cast bf16.
        w_mat = jnp.transpose(w, (2, 3, 1, 0)).reshape(kh * kw * cin_, cout)
        return w_mat.astype(jnp.bfloat16), b.reshape(1, cout).astype(jnp.float32)

    keys = jax.random.split(key, 8)
    p = {}
    p['stem_w'], p['stem_b'] = conv_init(keys[0], chans[0], cin, 3, 3)
    p['s1_w'], p['s1_b'] = conv_init(keys[1], chans[1], chans[0], 3, 3)
    p['s2_w'], p['s2_b'] = conv_init(keys[2], chans[2], chans[1], 3, 3)
    p['s3_w'], p['s3_b'] = conv_init(keys[3], chans[3], chans[2], 3, 3)
    p['lat1_w'], p['lat1_b'] = conv_init(keys[4], fpn_dim, chans[1], 1, 1)
    p['lat2_w'], p['lat2_b'] = conv_init(keys[5], fpn_dim, chans[2], 1, 1)
    p['lat3_w'], p['lat3_b'] = conv_init(keys[6], fpn_dim, chans[3], 1, 1)
    p['smooth_w'], p['smooth_b'] = conv_init(keys[7], fpn_dim, fpn_dim, 3, 3)
    return p


# ---------------------------------------------------------------------------
# UniBackbone_FPN forward
# ---------------------------------------------------------------------------
def uni_backbone_fpn_forward(params, img_nchw):
    x = jnp.transpose(img_nchw, (0, 2, 3, 1))  # NCHW -> NHWC

    # encoder (get_backbone('resnet'-lite)): multi-scale features @ stride 4/8/16
    x = conv2d(x, params['stem_w'], params['stem_b'], 3, 3, 2, 1, True)
    f1 = conv2d(x, params['s1_w'], params['s1_b'], 3, 3, 2, 1, True)
    f2 = conv2d(f1, params['s2_w'], params['s2_b'], 3, 3, 2, 1, True)
    f3 = conv2d(f2, params['s3_w'], params['s3_b'], 3, 3, 2, 1, True)

    # combinefeature: FPN 1x1 laterals + top-down merge + 3x3 smoothing
    l1 = conv2d(f1, params['lat1_w'], params['lat1_b'], 1, 1, 1, 0, False)
    l2 = conv2d(f2, params['lat2_w'], params['lat2_b'], 1, 1, 1, 0, False)
    l3 = conv2d(f3, params['lat3_w'], params['lat3_b'], 1, 1, 1, 0, False)

    p3 = l3
    p2 = pallas_add(l2, upsample2x(p3))
    p1 = pallas_add(l1, upsample2x(p2))
    out = conv2d(p1, params['smooth_w'], params['smooth_b'], 3, 3, 1, 1, True)

    out_nchw = jnp.transpose(out, (0, 3, 1, 2))  # back to NCHW, like PyTorch
    return {'out': out_nchw}


if __name__ == "__main__":
    key = jax.random.PRNGKey(0)
    k_param, k_data = jax.random.split(key)

    params = init_params(k_param, cin=4, fpn_dim=32)
    x = jax.random.normal(k_data, (2, 4, 16, 16), jnp.float32)  # NCHW

    fwd = jax.jit(uni_backbone_fpn_forward)
    out = fwd(params, x)
    jax.block_until_ready(out)

    assert out['out'].shape == (2, 32, 4, 4), out['out'].shape
    assert bool(jnp.all(jnp.isfinite(out['out'])))
    print("KERNEL_OK")
</pallas_src>

<mosaic_0001>
module attributes {stable_mosaic.version = 11 : i64} {
  func.func @_matmul_bias_kernel(%arg0: i32, %arg1: memref<128x36xbf16, #tpu.memory_space<vmem>>, %arg2: memref<36x8xbf16, #tpu.memory_space<vmem>>, %arg3: memref<1x8xf32, #tpu.memory_space<vmem>>, %arg4: memref<128x8xf32, #tpu.memory_space<vmem>>) attributes {dimension_semantics = [#tpu.dimension_semantics<parallel>], iteration_bounds = array<i64: 1>, scalar_prefetch = 0 : i64, scratch_operands = 0 : i64, tpu.core_type = #tpu.core_type<tc>, window_params = [{transform_indices = @transform_0, window_bounds = array<i64: 128, 36>}, {pipeline_mode = #tpu.pipeline_mode<synchronous>, transform_indices = @transform_1, window_bounds = array<i64: 36, 8>}, {pipeline_mode = #tpu.pipeline_mode<synchronous>, transform_indices = @transform_2, window_bounds = array<i64: 1, 8>}, {transform_indices = @transform_3, window_bounds = array<i64: 128, 8>}]} {
    %c0 = arith.constant 0 : index
    %c0_0 = arith.constant 0 : index
    %0 = vector.load %arg1[%c0, %c0_0] : memref<128x36xbf16, #tpu.memory_space<vmem>>, vector<128x36xbf16>
    %c0_1 = arith.constant 0 : index
    %c0_2 = arith.constant 0 : index
    %1 = vector.load %arg2[%c0_1, %c0_2] : memref<36x8xbf16, #tpu.memory_space<vmem>>, vector<36x8xbf16>
    %cst = arith.constant dense<0.000000e+00> : vector<128x8xf32>
    %2 = tpu.matmul %0, %1, %cst {dimension_numbers = #tpu.dot_dimension_numbers<[1], [0], [0], [1], [0, 0, 1, 1], [], []>} : vector<128x36xbf16>, vector<36x8xbf16>, vector<128x8xf32> -> vector<128x8xf32>
    %c0_3 = arith.constant 0 : index
    %c0_4 = arith.constant 0 : index
    %3 = vector.load %arg3[%c0_3, %c0_4] : memref<1x8xf32, #tpu.memory_space<vmem>>, vector<1x8xf32>
    %4 = vector.broadcast %3 : vector<1x8xf32> to vector<128x8xf32>
    %5 = arith.addf %2, %4 : vector<128x8xf32>
    %cst_5 = arith.constant 0.000000e+00 : f32
    %6 = vector.broadcast %cst_5 : f32 to vector<128x8xf32>
    %7 = arith.maximumf %5, %6 : vector<128x8xf32>
    %c0_6 = arith.constant 0 : index
    %c0_7 = arith.constant 0 : index
    %8 = vector.load %arg4[%c0_6, %c0_7] : memref<128x8xf32, #tpu.memory_space<vmem>>, vector<128x8xf32>
    tpu.vector_store %arg4[%c0_6, %c0_7], %7 {strides = array<i32>} : memref<128x8xf32, #tpu.memory_space<vmem>>, vector<128x8xf32>,
    return
  }
  func.func @transform_0(%arg0: i32) -> (i32, i32) {
    %c0_i32 = arith.constant 0 : i32
    %c0_i32_0 = arith.constant 0 : i32
    return %arg0, %c0_i32 : i32, i32
  }
  func.func @transform_1(%arg0: i32) -> (i32, i32) {
    %c0_i32 = arith.constant 0 : i32
    %c0_i32_0 = arith.constant 0 : i32
    %c0_i32_1 = arith.constant 0 : i32
    return %c0_i32, %c0_i32_0 : i32, i32
  }
  func.func @transform_2(%arg0: i32) -> (i32, i32) {
    %c0_i32 = arith.constant 0 : i32
    %c0_i32_0 = arith.constant 0 : i32
    %c0_i32_1 = arith.constant 0 : i32
    return %c0_i32, %c0_i32_0 : i32, i32
  }
  func.func @transform_3(%arg0: i32) -> (i32, i32) {
    %c0_i32 = arith.constant 0 : i32
    %c0_i32_0 = arith.constant 0 : i32
    return %arg0, %c0_i32 : i32, i32
  }
}

module attributes {stable_mosaic.version = 11 : i64} {
  func.func @_matmul_bias_kernel(%arg0: i32, %arg1: memref<32x72xbf16, #tpu.memory_space<vmem>>, %arg2: memref<72x16xbf16, #tpu.memory_space<vmem>>, %arg3: memref<1x16xf32, #tpu.memory_space<vmem>>, %arg4: memref<32x16xf32, #tpu.memory_space<vmem>>) attributes {dimension_semantics = [#tpu.dimension_semantics<parallel>], iteration_bounds = array<i64: 1>, scalar_prefetch = 0 : i64, scratch_operands = 0 : i64, tpu.core_type = #tpu.core_type<tc>, window_params = [{transform_indices = @transform_0, window_bounds = array<i64: 32, 72>}, {pipeline_mode = #tpu.pipeline_mode<synchronous>, transform_indices = @transform_1, window_bounds = array<i64: 72, 16>}, {pipeline_mode = #tpu.pipeline_mode<synchronous>, transform_indices = @transform_2, window_bounds = array<i64: 1, 16>}, {transform_indices = @transform_3, window_bounds = array<i64: 32, 16>}]} {
    %c0 = arith.constant 0 : index
    %c0_0 = arith.constant 0 : index
    %0 = vector.load %arg1[%c0, %c0_0] : memref<32x72xbf16, #tpu.memory_space<vmem>>, vector<32x72xbf16>
    %c0_1 = arith.constant 0 : index
    %c0_2 = arith.constant 0 : index
    %1 = vector.load %arg2[%c0_1, %c0_2] : memref<72x16xbf16, #tpu.memory_space<vmem>>, vector<72x16xbf16>
    %cst = arith.constant dense<0.000000e+00> : vector<32x16xf32>
    %2 = tpu.matmul %0, %1, %cst {dimension_numbers = #tpu.dot_dimension_numbers<[1], [0], [0], [1], [0, 0, 1, 1], [], []>} : vector<32x72xbf16>, vector<72x16xbf16>, vector<32x16xf32> -> vector<32x16xf32>
    %c0_3 = arith.constant 0 : index
    %c0_4 = arith.constant 0 : index
    %3 = vector.load %arg3[%c0_3, %c0_4] : memref<1x16xf32, #tpu.memory_space<vmem>>, vector<1x16xf32>
    %4 = vector.broadcast %3 : vector<1x16xf32> to vector<32x16xf32>
    %5 = arith.addf %2, %4 : vector<32x16xf32>
    %cst_5 = arith.constant 0.000000e+00 : f32
    %6 = vector.broadcast %cst_5 : f32 to vector<32x16xf32>
    %7 = arith.maximumf %5, %6 : vector<32x16xf32>
    %c0_6 = arith.constant 0 : index
    %c0_7 = arith.constant 0 : index
    %8 = vector.load %arg4[%c0_6, %c0_7] : memref<32x16xf32, #tpu.memory_space<vmem>>, vector<32x16xf32>
    tpu.vector_store %arg4[%c0_6, %c0_7], %7 {strides = array<i32>} : memref<32x16xf32, #tpu.memory_space<vmem>>, vector<32x16xf32>,
    return
  }
  func.func @transform_0(%arg0: i32) -> (i32, i32) {
    %c0_i32 = arith.constant 0 : i32
    %c0_i32_0 = arith.constant 0 : i32
    return %arg0, %c0_i32 : i32, i32
  }
  func.func @transform_1(%arg0: i32) -> (i32, i32) {
    %c0_i32 = arith.constant 0 : i32
    %c0_i32_0 = arith.constant 0 : i32
    %c0_i32_1 = arith.constant 0 : i32
    return %c0_i32, %c0_i32_0 : i32, i32
  }
  func.func @transform_2(%arg0: i32) -> (i32, i32) {
    %c0_i32 = arith.constant 0 : i32
    %c0_i32_0 = arith.constant 0 : i32
    %c0_i32_1 = arith.constant 0 : i32
    return %c0_i32, %c0_i32_0 : i32, i32
  }
  func.func @transform_3(%arg0: i32) -> (i32, i32) {
    %c0_i32 = arith.constant 0 : i32
    %c0_i32_0 = arith.constant 0 : i32
    return %arg0, %c0_i32 : i32, i32
  }
}

module attributes {stable_mosaic.version = 11 : i64} {
  func.func @_matmul_bias_kernel(%arg0: i32, %arg1: memref<16x144xbf16, #tpu.memory_space<vmem>>, %arg2: memref<144x32xbf16, #tpu.memory_space<vmem>>, %arg3: memref<1x32xf32, #tpu.memory_space<vmem>>, %arg4: memref<16x32xf32, #tpu.memory_space<vmem>>) attributes {dimension_semantics = [#tpu.dimension_semantics<parallel>], iteration_bounds = array<i64: 1>, scalar_prefetch = 0 : i64, scratch_operands = 0 : i64, tpu.core_type = #tpu.core_type<tc>, window_params = [{transform_indices = @transform_0, window_bounds = array<i64: 16, 144>}, {pipeline_mode = #tpu.pipeline_mode<synchronous>, transform_indices = @transform_1, window_bounds = array<i64: 144, 32>}, {pipeline_mode = #tpu.pipeline_mode<synchronous>, transform_indices = @transform_2, window_bounds = array<i64: 1, 32>}, {transform_indices = @transform_3, window_bounds = array<i64: 16, 32>}]} {
    %c0 = arith.constant 0 : index
    %c0_0 = arith.constant 0 : index
    %0 = vector.load %arg1[%c0, %c0_0] : memref<16x144xbf16, #tpu.memory_space<vmem>>, vector<16x144xbf16>
    %c0_1 = arith.constant 0 : index
    %c0_2 = arith.constant 0 : index
    %1 = vector.load %arg2[%c0_1, %c0_2] : memref<144x32xbf16, #tpu.memory_space<vmem>>, vector<144x32xbf16>
    %cst = arith.constant dense<0.000000e+00> : vector<16x32xf32>
    %2 = tpu.matmul %0, %1, %cst {dimension_numbers = #tpu.dot_dimension_numbers<[1], [0], [0], [1], [0, 0, 1, 1], [], []>} : vector<16x144xbf16>, vector<144x32xbf16>, vector<16x32xf32> -> vector<16x32xf32>
    %c0_3 = arith.constant 0 : index
    %c0_4 = arith.constant 0 : index
    %3 = vector.load %arg3[%c0_3, %c0_4] : memref<1x32xf32, #tpu.memory_space<vmem>>, vector<1x32xf32>
    %4 = vector.broadcast %3 : vector<1x32xf32> to vector<16x32xf32>
    %5 = arith.addf %2, %4 : vector<16x32xf32>
    %cst_5 = arith.constant 0.000000e+00 : f32
    %6 = vector.broadcast %cst_5 : f32 to vector<16x32xf32>
    %7 = arith.maximumf %5, %6 : vector<16x32xf32>
    %c0_6 = arith.constant 0 : index
    %c0_7 = arith.constant 0 : index
    %8 = vector.load %arg4[%c0_6, %c0_7] : memref<16x32xf32, #tpu.memory_space<vmem>>, vector<16x32xf32>
    tpu.vector_store %arg4[%c0_6, %c0_7], %7 {strides = array<i32>} : memref<16x32xf32, #tpu.memory_space<vmem>>, vector<16x32xf32>,
    return
  }
  func.func @transform_0(%arg0: i32) -> (i32, i32) {
    %c0_i32 = arith.constant 0 : i32
    %c0_i32_0 = arith.constant 0 : i32
    return %arg0, %c0_i32 : i32, i32
  }
  func.func @transform_1(%arg0: i32) -> (i32, i32) {
    %c0_i32 = arith.constant 0 : i32
    %c0_i32_0 = arith.constant 0 : i32
    %c0_i32_1 = arith.constant 0 : i32
    return %c0_i32, %c0_i32_0 : i32, i32
  }
  func.func @transform_2(%arg0: i32) -> (i32, i32) {
    %c0_i32 = arith.constant 0 : i32
    %c0_i32_0 = arith.constant 0 : i32
    %c0_i32_1 = arith.constant 0 : i32
    return %c0_i32, %c0_i32_0 : i32, i32
  }
  func.func @transform_3(%arg0: i32) -> (i32, i32) {
    %c0_i32 = arith.constant 0 : i32
    %c0_i32_0 = arith.constant 0 : i32
    return %arg0, %c0_i32 : i32, i32
  }
}

module attributes {stable_mosaic.version = 11 : i64} {
  func.func @_matmul_bias_kernel(%arg0: i32, %arg1: memref<16x288xbf16, #tpu.memory_space<vmem>>, %arg2: memref<288x64xbf16, #tpu.memory_space<vmem>>, %arg3: memref<1x64xf32, #tpu.memory_space<vmem>>, %arg4: memref<16x64xf32, #tpu.memory_space<vmem>>) attributes {dimension_semantics = [#tpu.dimension_semantics<parallel>], iteration_bounds = array<i64: 1>, scalar_prefetch = 0 : i64, scratch_operands = 0 : i64, tpu.core_type = #tpu.core_type<tc>, window_params = [{transform_indices = @transform_0, window_bounds = array<i64: 16, 288>}, {pipeline_mode = #tpu.pipeline_mode<synchronous>, transform_indices = @transform_1, window_bounds = array<i64: 288, 64>}, {pipeline_mode = #tpu.pipeline_mode<synchronous>, transform_indices = @transform_2, window_bounds = array<i64: 1, 64>}, {transform_indices = @transform_3, window_bounds = array<i64: 16, 64>}]} {
    %c0 = arith.constant 0 : index
    %c0_0 = arith.constant 0 : index
    %0 = vector.load %arg1[%c0, %c0_0] : memref<16x288xbf16, #tpu.memory_space<vmem>>, vector<16x288xbf16>
    %c0_1 = arith.constant 0 : index
    %c0_2 = arith.constant 0 : index
    %1 = vector.load %arg2[%c0_1, %c0_2] : memref<288x64xbf16, #tpu.memory_space<vmem>>, vector<288x64xbf16>
    %cst = arith.constant dense<0.000000e+00> : vector<16x64xf32>
    %2 = tpu.matmul %0, %1, %cst {dimension_numbers = #tpu.dot_dimension_numbers<[1], [0], [0], [1], [0, 0, 1, 1], [], []>} : vector<16x288xbf16>, vector<288x64xbf16>, vector<16x64xf32> -> vector<16x64xf32>
    %c0_3 = arith.constant 0 : index
    %c0_4 = arith.constant 0 : index
    %3 = vector.load %arg3[%c0_3, %c0_4] : memref<1x64xf32, #tpu.memory_space<vmem>>, vector<1x64xf32>
    %4 = vector.broadcast %3 : vector<1x64xf32> to vector<16x64xf32>
    %5 = arith.addf %2, %4 : vector<16x64xf32>
    %cst_5 = arith.constant 0.000000e+00 : f32
    %6 = vector.broadcast %cst_5 : f32 to vector<16x64xf32>
    %7 = arith.maximumf %5, %6 : vector<16x64xf32>
    %c0_6 = arith.constant 0 : index
    %c0_7 = arith.constant 0 : index
    %8 = vector.load %arg4[%c0_6, %c0_7] : memref<16x64xf32, #tpu.memory_space<vmem>>, vector<16x64xf32>
    tpu.vector_store %arg4[%c0_6, %c0_7], %7 {strides = array<i32>} : memref<16x64xf32, #tpu.memory_space<vmem>>, vector<16x64xf32>,
    return
  }
  func.func @transform_0(%arg0: i32) -> (i32, i32) {
    %c0_i32 = arith.constant 0 : i32
    %c0_i32_0 = arith.constant 0 : i32
    return %arg0, %c0_i32 : i32, i32
  }
  func.func @transform_1(%arg0: i32) -> (i32, i32) {
    %c0_i32 = arith.constant 0 : i32
    %c0_i32_0 = arith.constant 0 : i32
    %c0_i32_1 = arith.constant 0 : i32
    return %c0_i32, %c0_i32_0 : i32, i32
  }
  func.func @transform_2(%arg0: i32) -> (i32, i32) {
    %c0_i32 = arith.constant 0 : i32
    %c0_i32_0 = arith.constant 0 : i32
    %c0_i32_1 = arith.constant 0 : i32
    return %c0_i32, %c0_i32_0 : i32, i32
  }
  func.func @transform_3(%arg0: i32) -> (i32, i32) {
    %c0_i32 = arith.constant 0 : i32
    %c0_i32_0 = arith.constant 0 : i32
    return %arg0, %c0_i32 : i32, i32
  }
}

module attributes {stable_mosaic.version = 11 : i64} {
  func.func @_matmul_bias_kernel(%arg0: i32, %arg1: memref<16x64xbf16, #tpu.memory_space<vmem>>, %arg2: memref<64x32xbf16, #tpu.memory_space<vmem>>, %arg3: memref<1x32xf32, #tpu.memory_space<vmem>>, %arg4: memref<16x32xf32, #tpu.memory_space<vmem>>) attributes {dimension_semantics = [#tpu.dimension_semantics<parallel>], iteration_bounds = array<i64: 1>, scalar_prefetch = 0 : i64, scratch_operands = 0 : i64, tpu.core_type = #tpu.core_type<tc>, window_params = [{transform_indices = @transform_0, window_bounds = array<i64: 16, 64>}, {pipeline_mode = #tpu.pipeline_mode<synchronous>, transform_indices = @transform_1, window_bounds = array<i64: 64, 32>}, {pipeline_mode = #tpu.pipeline_mode<synchronous>, transform_indices = @transform_2, window_bounds = array<i64: 1, 32>}, {transform_indices = @transform_3, window_bounds = array<i64: 16, 32>}]} {
    %c0 = arith.constant 0 : index
    %c0_0 = arith.constant 0 : index
    %0 = vector.load %arg1[%c0, %c0_0] : memref<16x64xbf16, #tpu.memory_space<vmem>>, vector<16x64xbf16>
    %c0_1 = arith.constant 0 : index
    %c0_2 = arith.constant 0 : index
    %1 = vector.load %arg2[%c0_1, %c0_2] : memref<64x32xbf16, #tpu.memory_space<vmem>>, vector<64x32xbf16>
    %cst = arith.constant dense<0.000000e+00> : vector<16x32xf32>
    %2 = tpu.matmul %0, %1, %cst {dimension_numbers = #tpu.dot_dimension_numbers<[1], [0], [0], [1], [0, 0, 1, 1], [], []>} : vector<16x64xbf16>, vector<64x32xbf16>, vector<16x32xf32> -> vector<16x32xf32>
    %c0_3 = arith.constant 0 : index
    %c0_4 = arith.constant 0 : index
    %3 = vector.load %arg3[%c0_3, %c0_4] : memref<1x32xf32, #tpu.memory_space<vmem>>, vector<1x32xf32>
    %4 = vector.broadcast %3 : vector<1x32xf32> to vector<16x32xf32>
    %5 = arith.addf %2, %4 : vector<16x32xf32>
    %c0_5 = arith.constant 0 : index
    %c0_6 = arith.constant 0 : index
    %6 = vector.load %arg4[%c0_5, %c0_6] : memref<16x32xf32, #tpu.memory_space<vmem>>, vector<16x32xf32>
    tpu.vector_store %arg4[%c0_5, %c0_6], %5 {strides = array<i32>} : memref<16x32xf32, #tpu.memory_space<vmem>>, vector<16x32xf32>,
    return
  }
  func.func @transform_0(%arg0: i32) -> (i32, i32) {
    %c0_i32 = arith.constant 0 : i32
    %c0_i32_0 = arith.constant 0 : i32
    return %arg0, %c0_i32 : i32, i32
  }
  func.func @transform_1(%arg0: i32) -> (i32, i32) {
    %c0_i32 = arith.constant 0 : i32
    %c0_i32_0 = arith.constant 0 : i32
    %c0_i32_1 = arith.constant 0 : i32
    return %c0_i32, %c0_i32_0 : i32, i32
  }
  func.func @transform_2(%arg0: i32) -> (i32, i32) {
    %c0_i32 = arith.constant 0 : i32
    %c0_i32_0 = arith.constant 0 : i32
    %c0_i32_1 = arith.constant 0 : i32
    return %c0_i32, %c0_i32_0 : i32, i32
  }
  func.func @transform_3(%arg0: i32) -> (i32, i32) {
    %c0_i32 = arith.constant 0 : i32
    %c0_i32_0 = arith.constant 0 : i32
    return %arg0, %c0_i32 : i32, i32
  }
}

module attributes {stable_mosaic.version = 11 : i64} {
  func.func @_matmul_bias_kernel(%arg0: i32, %arg1: memref<16x32xbf16, #tpu.memory_space<vmem>>, %arg2: memref<32x32xbf16, #tpu.memory_space<vmem>>, %arg3: memref<1x32xf32, #tpu.memory_space<vmem>>, %arg4: memref<16x32xf32, #tpu.memory_space<vmem>>) attributes {dimension_semantics = [#tpu.dimension_semantics<parallel>], iteration_bounds = array<i64: 1>, scalar_prefetch = 0 : i64, scratch_operands = 0 : i64, tpu.core_type = #tpu.core_type<tc>, window_params = [{transform_indices = @transform_0, window_bounds = array<i64: 16, 32>}, {pipeline_mode = #tpu.pipeline_mode<synchronous>, transform_indices = @transform_1, window_bounds = array<i64: 32, 32>}, {pipeline_mode = #tpu.pipeline_mode<synchronous>, transform_indices = @transform_2, window_bounds = array<i64: 1, 32>}, {transform_indices = @transform_3, window_bounds = array<i64: 16, 32>}]} {
    %c0 = arith.constant 0 : index
    %c0_0 = arith.constant 0 : index
    %0 = vector.load %arg1[%c0, %c0_0] : memref<16x32xbf16, #tpu.memory_space<vmem>>, vector<16x32xbf16>
    %c0_1 = arith.constant 0 : index
    %c0_2 = arith.constant 0 : index
    %1 = vector.load %arg2[%c0_1, %c0_2] : memref<32x32xbf16, #tpu.memory_space<vmem>>, vector<32x32xbf16>
    %cst = arith.constant dense<0.000000e+00> : vector<16x32xf32>
    %2 = tpu.matmul %0, %1, %cst {dimension_numbers = #tpu.dot_dimension_numbers<[1], [0], [0], [1], [0, 0, 1, 1], [], []>} : vector<16x32xbf16>, vector<32x32xbf16>, vector<16x32xf32> -> vector<16x32xf32>
    %c0_3 = arith.constant 0 : index
    %c0_4 = arith.constant 0 : index
    %3 = vector.load %arg3[%c0_3, %c0_4] : memref<1x32xf32, #tpu.memory_space<vmem>>, vector<1x32xf32>
    %4 = vector.broadcast %3 : vector<1x32xf32> to vector<16x32xf32>
    %5 = arith.addf %2, %4 : vector<16x32xf32>
    %c0_5 = arith.constant 0 : index
    %c0_6 = arith.constant 0 : index
    %6 = vector.load %arg4[%c0_5, %c0_6] : memref<16x32xf32, #tpu.memory_space<vmem>>, vector<16x32xf32>
    tpu.vector_store %arg4[%c0_5, %c0_6], %5 {strides = array<i32>} : memref<16x32xf32, #tpu.memory_space<vmem>>, vector<16x32xf32>,
    return
  }
  func.func @transform_0(%arg0: i32) -> (i32, i32) {
    %c0_i32 = arith.constant 0 : i32
    %c0_i32_0 = arith.constant 0 : i32
    return %arg0, %c0_i32 : i32, i32
  }
  func.func @transform_1(%arg0: i32) -> (i32, i32) {
    %c0_i32 = arith.constant 0 : i32
    %c0_i32_0 = arith.constant 0 : i32
    %c0_i32_1 = arith.constant 0 : i32
    return %c0_i32, %c0_i32_0 : i32, i32
  }
  func.func @transform_2(%arg0: i32) -> (i32, i32) {
    %c0_i32 = arith.constant 0 : i32
    %c0_i32_0 = arith.constant 0 : i32
    %c0_i32_1 = arith.constant 0 : i32
    return %c0_i32, %c0_i32_0 : i32, i32
  }
  func.func @transform_3(%arg0: i32) -> (i32, i32) {
    %c0_i32 = arith.constant 0 : i32
    %c0_i32_0 = arith.constant 0 : i32
    return %arg0, %c0_i32 : i32, i32
  }
}

module attributes {stable_mosaic.version = 11 : i64} {
  func.func @_add_kernel(%arg0: i32, %arg1: memref<8x128xf32, #tpu.memory_space<vmem>>, %arg2: memref<8x128xf32, #tpu.memory_space<vmem>>, %arg3: memref<8x128xf32, #tpu.memory_space<vmem>>) attributes {dimension_semantics = [#tpu.dimension_semantics<parallel>], iteration_bounds = array<i64: 1>, scalar_prefetch = 0 : i64, scratch_operands = 0 : i64, tpu.core_type = #tpu.core_type<tc>, window_params = [{transform_indices = @transform_0, window_bounds = array<i64: 8, 128>}, {transform_indices = @transform_1, window_bounds = array<i64: 8, 128>}, {transform_indices = @transform_2, window_bounds = array<i64: 8, 128>}]} {
    %c0 = arith.constant 0 : index
    %c0_0 = arith.constant 0 : index
    %0 = vector.load %arg1[%c0, %c0_0] : memref<8x128xf32, #tpu.memory_space<vmem>>, vector<8x128xf32>
    %c0_1 = arith.constant 0 : index
    %c0_2 = arith.constant 0 : index
    %1 = vector.load %arg2[%c0_1, %c0_2] : memref<8x128xf32, #tpu.memory_space<vmem>>, vector<8x128xf32>
    %2 = arith.addf %0, %1 : vector<8x128xf32>
    %c0_3 = arith.constant 0 : index
    %c0_4 = arith.constant 0 : index
    %3 = vector.load %arg3[%c0_3, %c0_4] : memref<8x128xf32, #tpu.memory_space<vmem>>, vector<8x128xf32>
    tpu.vector_store %arg3[%c0_3, %c0_4], %2 {strides = array<i32>} : memref<8x128xf32, #tpu.memory_space<vmem>>, vector<8x128xf32>,
    return
  }
  func.func @transform_0(%arg0: i32) -> (i32, i32) {
    %c0_i32 = arith.constant 0 : i32
    %c0_i32_0 = arith.constant 0 : i32
    return %arg0, %c0_i32 : i32, i32
  }
  func.func @transform_1(%arg0: i32) -> (i32, i32) {
    %c0_i32 = arith.constant 0 : i32
    %c0_i32_0 = arith.constant 0 : i32
    return %arg0, %c0_i32 : i32, i32
  }
  func.func @transform_2(%arg0: i32) -> (i32, i32) {
    %c0_i32 = arith.constant 0 : i32
    %c0_i32_0 = arith.constant 0 : i32
    return %arg0, %c0_i32 : i32, i32
  }
}

module attributes {stable_mosaic.version = 11 : i64} {
  func.func @_matmul_bias_kernel(%arg0: i32, %arg1: memref<32x16xbf16, #tpu.memory_space<vmem>>, %arg2: memref<16x32xbf16, #tpu.memory_space<vmem>>, %arg3: memref<1x32xf32, #tpu.memory_space<vmem>>, %arg4: memref<32x32xf32, #tpu.memory_space<vmem>>) attributes {dimension_semantics = [#tpu.dimension_semantics<parallel>], iteration_bounds = array<i64: 1>, scalar_prefetch = 0 : i64, scratch_operands = 0 : i64, tpu.core_type = #tpu.core_type<tc>, window_params = [{transform_indices = @transform_0, window_bounds = array<i64: 32, 16>}, {pipeline_mode = #tpu.pipeline_mode<synchronous>, transform_indices = @transform_1, window_bounds = array<i64: 16, 32>}, {pipeline_mode = #tpu.pipeline_mode<synchronous>, transform_indices = @transform_2, window_bounds = array<i64: 1, 32>}, {transform_indices = @transform_3, window_bounds = array<i64: 32, 32>}]} {
    %c0 = arith.constant 0 : index
    %c0_0 = arith.constant 0 : index
    %0 = vector.load %arg1[%c0, %c0_0] : memref<32x16xbf16, #tpu.memory_space<vmem>>, vector<32x16xbf16>
    %c0_1 = arith.constant 0 : index
    %c0_2 = arith.constant 0 : index
    %1 = vector.load %arg2[%c0_1, %c0_2] : memref<16x32xbf16, #tpu.memory_space<vmem>>, vector<16x32xbf16>
    %cst = arith.constant dense<0.000000e+00> : vector<32x32xf32>
    %2 = tpu.matmul %0, %1, %cst {dimension_numbers = #tpu.dot_dimension_numbers<[1], [0], [0], [1], [0, 0, 1, 1], [], []>} : vector<32x16xbf16>, vector<16x32xbf16>, vector<32x32xf32> -> vector<32x32xf32>
    %c0_3 = arith.constant 0 : index
    %c0_4 = arith.constant 0 : index
    %3 = vector.load %arg3[%c0_3, %c0_4] : memref<1x32xf32, #tpu.memory_space<vmem>>, vector<1x32xf32>
    %4 = vector.broadcast %3 : vector<1x32xf32> to vector<32x32xf32>
    %5 = arith.addf %2, %4 : vector<32x32xf32>
    %c0_5 = arith.constant 0 : index
    %c0_6 = arith.constant 0 : index
    %6 = vector.load %arg4[%c0_5, %c0_6] : memref<32x32xf32, #tpu.memory_space<vmem>>, vector<32x32xf32>
    tpu.vector_store %arg4[%c0_5, %c0_6], %5 {strides = array<i32>} : memref<32x32xf32, #tpu.memory_space<vmem>>, vector<32x32xf32>,
    return
  }
  func.func @transform_0(%arg0: i32) -> (i32, i32) {
    %c0_i32 = arith.constant 0 : i32
    %c0_i32_0 = arith.constant 0 : i32
    return %arg0, %c0_i32 : i32, i32
  }
  func.func @transform_1(%arg0: i32) -> (i32, i32) {
    %c0_i32 = arith.constant 0 : i32
    %c0_i32_0 = arith.constant 0 : i32
    %c0_i32_1 = arith.constant 0 : i32
    return %c0_i32, %c0_i32_0 : i32, i32
  }
  func.func @transform_2(%arg0: i32) -> (i32, i32) {
    %c0_i32 = arith.constant 0 : i32
    %c0_i32_0 = arith.constant 0 : i32
    %c0_i32_1 = arith.constant 0 : i32
    return %c0_i32, %c0_i32_0 : i32, i32
  }
  func.func @transform_3(%arg0: i32) -> (i32, i32) {
    %c0_i32 = arith.constant 0 : i32
    %c0_i32_0 = arith.constant 0 : i32
    return %arg0, %c0_i32 : i32, i32
  }
}

module attributes {stable_mosaic.version = 11 : i64} {
  func.func @_matmul_bias_kernel(%arg0: i32, %arg1: memref<32x288xbf16, #tpu.memory_space<vmem>>, %arg2: memref<288x32xbf16, #tpu.memory_space<vmem>>, %arg3: memref<1x32xf32, #tpu.memory_space<vmem>>, %arg4: memref<32x32xf32, #tpu.memory_space<vmem>>) attributes {dimension_semantics = [#tpu.dimension_semantics<parallel>], iteration_bounds = array<i64: 1>, scalar_prefetch = 0 : i64, scratch_operands = 0 : i64, tpu.core_type = #tpu.core_type<tc>, window_params = [{transform_indices = @transform_0, window_bounds = array<i64: 32, 288>}, {pipeline_mode = #tpu.pipeline_mode<synchronous>, transform_indices = @transform_1, window_bounds = array<i64: 288, 32>}, {pipeline_mode = #tpu.pipeline_mode<synchronous>, transform_indices = @transform_2, window_bounds = array<i64: 1, 32>}, {transform_indices = @transform_3, window_bounds = array<i64: 32, 32>}]} {
    %c0 = arith.constant 0 : index
    %c0_0 = arith.constant 0 : index
    %0 = vector.load %arg1[%c0, %c0_0] : memref<32x288xbf16, #tpu.memory_space<vmem>>, vector<32x288xbf16>
    %c0_1 = arith.constant 0 : index
    %c0_2 = arith.constant 0 : index
    %1 = vector.load %arg2[%c0_1, %c0_2] : memref<288x32xbf16, #tpu.memory_space<vmem>>, vector<288x32xbf16>
    %cst = arith.constant dense<0.000000e+00> : vector<32x32xf32>
    %2 = tpu.matmul %0, %1, %cst {dimension_numbers = #tpu.dot_dimension_numbers<[1], [0], [0], [1], [0, 0, 1, 1], [], []>} : vector<32x288xbf16>, vector<288x32xbf16>, vector<32x32xf32> -> vector<32x32xf32>
    %c0_3 = arith.constant 0 : index
    %c0_4 = arith.constant 0 : index
    %3 = vector.load %arg3[%c0_3, %c0_4] : memref<1x32xf32, #tpu.memory_space<vmem>>, vector<1x32xf32>
    %4 = vector.broadcast %3 : vector<1x32xf32> to vector<32x32xf32>
    %5 = arith.addf %2, %4 : vector<32x32xf32>
    %cst_5 = arith.constant 0.000000e+00 : f32
    %6 = vector.broadcast %cst_5 : f32 to vector<32x32xf32>
    %7 = arith.maximumf %5, %6 : vector<32x32xf32>
    %c0_6 = arith.constant 0 : index
    %c0_7 = arith.constant 0 : index
    %8 = vector.load %arg4[%c0_6, %c0_7] : memref<32x32xf32, #tpu.memory_space<vmem>>, vector<32x32xf32>
    tpu.vector_store %arg4[%c0_6, %c0_7], %7 {strides = array<i32>} : memref<32x32xf32, #tpu.memory_space<vmem>>, vector<32x32xf32>,
    return
  }
  func.func @transform_0(%arg0: i32) -> (i32, i32) {
    %c0_i32 = arith.constant 0 : i32
    %c0_i32_0 = arith.constant 0 : i32
    return %arg0, %c0_i32 : i32, i32
  }
  func.func @transform_1(%arg0: i32) -> (i32, i32) {
    %c0_i32 = arith.constant 0 : i32
    %c0_i32_0 = arith.constant 0 : i32
    %c0_i32_1 = arith.constant 0 : i32
    return %c0_i32, %c0_i32_0 : i32, i32
  }
  func.func @transform_2(%arg0: i32) -> (i32, i32) {
    %c0_i32 = arith.constant 0 : i32
    %c0_i32_0 = arith.constant 0 : i32
    %c0_i32_1 = arith.constant 0 : i32
    return %c0_i32, %c0_i32_0 : i32, i32
  }
  func.func @transform_3(%arg0: i32) -> (i32, i32) {
    %c0_i32 = arith.constant 0 : i32
    %c0_i32_0 = arith.constant 0 : i32
    return %arg0, %c0_i32 : i32, i32
  }
}

</mosaic_0001>

<bundles_post_ra>
// kernel: uni_backbone_fpn_forward.10
= control target key start
LH: loop header
LB: loop body
LE: loop exit
PB: predicated region body
PF: predicated region fallthrough
CT: control target
= control target key end

     0   :  { %vm120_vm0 = vcmask 1041408   ;;  %vm95_vm1 = vcmask 293888   ;;  %vm189_vm2 = vcmask 64512   ;;  %s406_s1 = inlined_call_operand.vmem [shape: bf16[36,8], index: 1, kind: input, shape index: {}]   ;;  %s407_s2 = inlined_call_operand.vmem [shape: f32[1,8], index: 2, kind: input, shape index: {}]   ;;  %s408_s0 = inlined_call_operand.vmem [shape: bf16[128,36], index: 0, kind: input, shape index: {}]   ;;  %s409_s3 = inlined_call_operand.vmem [shape: f32[128,8], index: 3, kind: output, shape index: {}]  }
   0x1   :  { %v35_v0 = vld [vmem:[%s406_s1 + $0x10] sm:$0x3]  ;;  %v267_v4 = vld [vmem:[%s406_s1 + $0x8] sm:$0xff]  ;;  %v266_v5 = vld [vmem:[%s406_s1] sm:$0xff] }
   0x2   :  { %v89_v1 = vunpack.c.l.b16 %v35_v0  ;;  %v258_v6 = vld [vmem:[%s408_s0] sm:$0xff]  ;;  %v260_v7 = vld [vmem:[%s408_s0 + $0x10] sm:$0xff]  ;;  %v259_v10 = vld [vmem:[%s408_s0 + $0x8] sm:$0xff] }
   0x3   :  { %v262_v8 = vld [vmem:[%s408_s0 + $0x20] sm:$0xff]  ;;  %v264_v9 = vld [vmem:[%s408_s0 + $0x30] sm:$0xff]  ;;  %v261_v11 = vld [vmem:[%s408_s0 + $0x18] sm:$0xff] }
   0x4   :  { %v92_v2 = vpack.c.b16 %v89_v1, %v89_v1  ;;  %v263_v12 = vld [vmem:[%s408_s0 + $0x28] sm:$0xff]  ;;  %v265_v13 = vld [vmem:[%s408_s0 + $0x38] sm:$0xff]  ;;  %v277_v14 = vld [vmem:[%s407_s2] ss:$0 sm:$0xff] }
   0x6   :  { %v122_v3 = vsel %vm120_vm0, %v92_v2, 0 }
   0x7   :  { %129 = vmatpush.bf16.msra.mxu0 %v122_v3  ;;  %268 = vmatpush.bf16.msra.mxu1 %v122_v3 }
   0x8   :  { %269 = vmatpush.bf16.msra.mxu2 %v122_v3  ;;  %270 = vmatpush.bf16.msra.mxu3 %v122_v3 }
   0xb   :  { %130 = vmatpush.bf16.msra.mxu0 %v267_v4  ;;  %271 = vmatpush.bf16.msra.mxu1 %v267_v4 }
   0xc   :  { %272 = vmatpush.bf16.msra.mxu2 %v267_v4  ;;  %273 = vmatpush.bf16.msra.mxu3 %v267_v4 }
   0xf   :  { %131 = vmatpush.bf16.msra.mxu0 %v266_v5  ;;  %274 = vmatpush.bf16.msra.mxu1 %v266_v5 }
  0x10   :  { %275 = vmatpush.bf16.msra.mxu2 %v266_v5  ;;  %276 = vmatpush.bf16.msra.mxu3 %v266_v5 }
  0x12   :  { %250 = vmatmul.msk.bf16.vlgmr.msra.gmra.mxu0 %vm95_vm1, %v258_v6  ;;  %252 = vmatmul.msk.bf16.vlgmr.msra.gmra.mxu1 %vm95_vm1, %v260_v7 }
  0x13   :  { %254 = vmatmul.msk.bf16.vlgmr.msra.gmra.mxu2 %vm95_vm1, %v262_v8  ;;  %256 = vmatmul.msk.bf16.vlgmr.msra.gmra.mxu3 %vm95_vm1, %v264_v9 }
  0x22   :  { %251 = vmatmul.msk.bf16.gmra.mxu0 %vm95_vm1, %v259_v10  ;;  %253 = vmatmul.msk.bf16.gmra.mxu1 %vm95_vm1, %v261_v11 }
  0x23   :  { %255 = vmatmul.msk.bf16.gmra.mxu2 %vm95_vm1, %v263_v12  ;;  %257 = vmatmul.msk.bf16.gmra.mxu3 %vm95_vm1, %v265_v13 }
  0x8f   :  { %v133_v15 = vpop.f32.mrf.mxu0  ;;  %v143_v16 = vpop.f32.mrf.mxu1 }
  0x90   :  { %v134_v17 = vadd.f32 %v277_v14, %v133_v15  ;;  %v144_v18 = vadd.f32 %v277_v14, %v143_v16 }
  0x92   :  { %v173_v19 = vmax.f32 %v134_v17, 0.0  ;;  %v177_v20 = vmax.f32 %v144_v18, 0.0 }
  0x94   :  { %190 = vst.msk [vmem:[%s409_s3] sm:$0xff] %vm189_vm2, %v173_v19 }
  0x95   :  { %194 = vst.msk [vmem:[%s409_s3 + $0x20] sm:$0xff] %vm189_vm2, %v177_v20 }
  0x96   :  { %v153_v21 = vpop.f32.mrf.mxu2  ;;  %v163_v22 = vpop.f32.mrf.mxu3 }
  0x97   :  { %v154_v23 = vadd.f32 %v277_v14, %v153_v21  ;;  %v164_v24 = vadd.f32 %v277_v14, %v163_v22  ;;  %v135_v25 = vpop.f32.mrf.mxu0  ;;  %v145_v26 = vpop.f32.mrf.mxu1 }
  0x98   :  { %v136_v27 = vadd.f32 %v277_v14, %v135_v25  ;;  %v146_v28 = vadd.f32 %v277_v14, %v145_v26 }
  0x99   :  { %v181_v29 = vmax.f32 %v154_v23, 0.0  ;;  %v185_v30 = vmax.f32 %v164_v24, 0.0 }
  0x9a   :  { %v174_v31 = vmax.f32 %v136_v27, 0.0  ;;  %v178_v32 = vmax.f32 %v146_v28, 0.0 }
  0x9b   :  { %198 = vst.msk [vmem:[%s409_s3 + $0x40] sm:$0xff] %vm189_vm2, %v181_v29 }
  0x9c   :  { %202 = vst.msk [vmem:[%s409_s3 + $0x60] sm:$0xff] %vm189_vm2, %v185_v30 }
  0x9d   :  { %191 = vst.msk [vmem:[%s409_s3 + $0x8] sm:$0xff] %vm189_vm2, %v174_v31 }
  0x9e   :  { %195 = vst.msk [vmem:[%s409_s3 + $0x28] sm:$0xff] %vm189_vm2, %v178_v32  ;;  %v155_v33 = vpop.f32.mrf.mxu2  ;;  %v165_v34 = vpop.f32.mrf.mxu3 }
  0x9f   :  { %v156_v35 = vadd.f32 %v277_v14, %v155_v33  ;;  %v166_v36 = vadd.f32 %v277_v14, %v165_v34  ;;  %v138_v37 = vpop.f32.mrf.mxu0  ;;  %v148_v38 = vpop.f32.mrf.mxu1 }
  0xa0   :  { %v139_v39 = vadd.f32 %v277_v14, %v138_v37  ;;  %v149_v40 = vadd.f32 %v277_v14, %v148_v38 }
  0xa1   :  { %v182_v41 = vmax.f32 %v156_v35, 0.0  ;;  %v186_v42 = vmax.f32 %v166_v36, 0.0 }
  0xa2   :  { %v175_v43 = vmax.f32 %v139_v39, 0.0  ;;  %v179_v44 = vmax.f32 %v149_v40, 0.0 }
  0xa3   :  { %199 = vst.msk [vmem:[%s409_s3 + $0x48] sm:$0xff] %vm189_vm2, %v182_v41 }
  0xa4   :  { %203 = vst.msk [vmem:[%s409_s3 + $0x68] sm:$0xff] %vm189_vm2, %v186_v42 }
  0xa5   :  { %192 = vst.msk [vmem:[%s409_s3 + $0x10] sm:$0xff] %vm189_vm2, %v175_v43 }
  0xa6   :  { %196 = vst.msk [vmem:[%s409_s3 + $0x30] sm:$0xff] %vm189_vm2, %v179_v44  ;;  %v158_v45 = vpop.f32.mrf.mxu2  ;;  %v168_v46 = vpop.f32.mrf.mxu3 }
  0xa7   :  { %v159_v47 = vadd.f32 %v277_v14, %v158_v45  ;;  %v169_v48 = vadd.f32 %v277_v14, %v168_v46  ;;  %v140_v49 = vpop.f32.mrf.mxu0  ;;  %v150_v50 = vpop.f32.mrf.mxu1 }
  0xa8   :  { %v141_v51 = vadd.f32 %v277_v14, %v140_v49  ;;  %v151_v52 = vadd.f32 %v277_v14, %v150_v50 }
  0xa9   :  { %v183_v53 = vmax.f32 %v159_v47, 0.0  ;;  %v187_v54 = vmax.f32 %v169_v48, 0.0 }
  0xaa   :  { %v176_v55 = vmax.f32 %v141_v51, 0.0  ;;  %v180_v56 = vmax.f32 %v151_v52, 0.0 }
  0xab   :  { %200 = vst.msk [vmem:[%s409_s3 + $0x50] sm:$0xff] %vm189_vm2, %v183_v53 }
  0xac   :  { %204 = vst.msk [vmem:[%s409_s3 + $0x70] sm:$0xff] %vm189_vm2, %v187_v54 }
  0xad   :  { %193 = vst.msk [vmem:[%s409_s3 + $0x18] sm:$0xff] %vm189_vm2, %v176_v55 }
  0xae   :  { %197 = vst.msk [vmem:[%s409_s3 + $0x38] sm:$0xff] %vm189_vm2, %v180_v56  ;;  %v160_v57 = vpop.f32.mrf.mxu2  ;;  %v170_v58 = vpop.f32.mrf.mxu3 }
  0xaf   :  { %v161_v59 = vadd.f32 %v277_v14, %v160_v57  ;;  %v171_v60 = vadd.f32 %v277_v14, %v170_v58 }
  0xb1   :  { %v184_v61 = vmax.f32 %v161_v59, 0.0  ;;  %v188_v62 = vmax.f32 %v171_v60, 0.0 }
  0xb3   :  { %201 = vst.msk [vmem:[%s409_s3 + $0x58] sm:$0xff] %vm189_vm2, %v184_v61 }
  0xb4   :  { %205 = vst.msk [vmem:[%s409_s3 + $0x78] sm:$0xff] %vm189_vm2, %v188_v62 }

// kernel: uni_backbone_fpn_forward.11
= control target key start
LH: loop header
LB: loop body
LE: loop exit
PB: predicated region body
PF: predicated region fallthrough
CT: control target
= control target key end

     0   :  { %vm76_vm0 = vcmask 1043456   ;;  %vm69_vm1 = vcmask 588800   ;;  %vm103_vm2 = vcmask 130048   ;;  %s206_s1 = inlined_call_operand.vmem [shape: bf16[72,16], index: 1, kind: input, shape index: {}]   ;;  %s207_s2 = inlined_call_operand.vmem [shape: f32[1,16], index: 2, kind: input, shape index: {}]   ;;  %s208_s0 = inlined_call_operand.vmem [shape: bf16[32,72], index: 0, kind: input, shape index: {}]   ;;  %s209_s3 = inlined_call_operand.vmem [shape: f32[32,16], index: 3, kind: output, shape index: {}]  }
   0x1   :  { %v27_v0 = vld [vmem:[%s206_s1 + $0x20] sm:$0xf]  ;;  %v143_v4 = vld [vmem:[%s206_s1 + $0x18] sm:$0xff]  ;;  %v142_v5 = vld [vmem:[%s206_s1 + $0x10] sm:$0xff] }
   0x2   :  { %v59_v1 = vunpack.c.l.b16 %v27_v0  ;;  %v141_v6 = vld [vmem:[%s206_s1 + $0x8] sm:$0xff]  ;;  %v140_v7 = vld [vmem:[%s206_s1] sm:$0xff] }
   0x3   :  { %v138_v8 = vld [vmem:[%s208_s0] sm:$0xff]  ;;  %v139_v9 = vld [vmem:[%s208_s0 + $0x8] sm:$0xff] }
   0x4   :  { %v64_v2 = vpack.c.b16 %v59_v1, %v59_v1  ;;  %v149_v10 = vld [vmem:[%s207_s2] ss:$0 sm:$0xff] }
   0x6   :  { %v78_v3 = vsel %vm76_vm0, %v64_v2, 0 }
   0x7   :  { %83 = vmatpush.bf16.msra.mxu0 %v78_v3  ;;  %144 = vmatpush.bf16.msra.mxu1 %v78_v3 }
   0xb   :  { %84 = vmatpush.bf16.msra.mxu0 %v143_v4  ;;  %145 = vmatpush.bf16.msra.mxu1 %v143_v4 }
   0xf   :  { %85 = vmatpush.bf16.msra.mxu0 %v142_v5  ;;  %146 = vmatpush.bf16.msra.mxu1 %v142_v5 }
  0x13   :  { %86 = vmatpush.bf16.msra.mxu0 %v141_v6  ;;  %147 = vmatpush.bf16.msra.mxu1 %v141_v6 }
  0x17   :  { %87 = vmatpush.bf16.msra.mxu0 %v140_v7  ;;  %148 = vmatpush.bf16.msra.mxu1 %v140_v7 }
  0x1a   :  { %136 = vmatmul.msk.bf16.vlgmr.msra.gmra.mxu0 %vm69_vm1, %v138_v8  ;;  %137 = vmatmul.msk.bf16.vlgmr.msra.gmra.mxu1 %vm69_vm1, %v139_v9 }
  0x97   :  { %v89_v11 = vpop.f32.mrf.mxu0  ;;  %v94_v12 = vpop.f32.mrf.mxu1 }
  0x98   :  { %v90_v13 = vadd.f32 %v149_v10, %v89_v11  ;;  %v95_v14 = vadd.f32 %v149_v10, %v94_v12 }
  0x9a   :  { %v99_v15 = vmax.f32 %v90_v13, 0.0  ;;  %v101_v16 = vmax.f32 %v95_v14, 0.0 }
  0x9c   :  { %104 = vst.msk [vmem:[%s209_s3] sm:$0xff] %vm103_vm2, %v99_v15 }
  0x9d   :  { %106 = vst.msk [vmem:[%s209_s3 + $0x10] sm:$0xff] %vm103_vm2, %v101_v16 }
  0x9f   :  { %v91_v17 = vpop.f32.mrf.mxu0  ;;  %v96_v18 = vpop.f32.mrf.mxu1 }
  0xa0   :  { %v92_v19 = vadd.f32 %v149_v10, %v91_v17  ;;  %v97_v20 = vadd.f32 %v149_v10, %v96_v18 }
  0xa2   :  { %v100_v21 = vmax.f32 %v92_v19, 0.0  ;;  %v102_v22 = vmax.f32 %v97_v20, 0.0 }
  0xa4   :  { %105 = vst.msk [vmem:[%s209_s3 + $0x8] sm:$0xff] %vm103_vm2, %v100_v21 }
  0xa5   :  { %107 = vst.msk [vmem:[%s209_s3 + $0x18] sm:$0xff] %vm103_vm2, %v102_v22 }

// kernel: uni_backbone_fpn_forward.12
= control target key start
LH: loop header
LB: loop body
LE: loop exit
PB: predicated region body
PF: predicated region fallthrough
CT: control target
= control target key end

     0   :  { %vm102_vm0 = vcmask 130048   ;;  %vm136_vm1 = vcmask 261120   ;;  %s268_s1 = inlined_call_operand.vmem [shape: bf16[144,32], index: 1, kind: input, shape index: {}]   ;;  %s269_s0 = inlined_call_operand.vmem [shape: bf16[16,144], index: 0, kind: input, shape index: {}]   ;;  %s270_s2 = inlined_call_operand.vmem [shape: f32[1,32], index: 2, kind: input, shape index: {}]   ;;  %s271_s3 = inlined_call_operand.vmem [shape: f32[16,32], index: 3, kind: output, shape index: {}]  }
   0x1   :  { %v197_v0 = vld [vmem:[%s268_s1 + $0x38] sm:$0xff]  ;;  %v196_v1 = vld [vmem:[%s268_s1 + $0x30] sm:$0xff]  ;;  %v198_v2 = vld [vmem:[%s268_s1 + $0x40] sm:$0xff] }
   0x2   :  { %106 = vmatpush.bf16.msra.mxu0 %v197_v0  ;;  %v188_v3 = vld [vmem:[%s269_s0 + $0x4] sm:$0xf]  ;;  %v147_v4 = vld [vmem:[%s269_s0 + $0x8] sm:$0xf0]  ;;  %127 = vmatpush.bf16.msra.mxu1 %v198_v2  ;;  %v193_v8 = vld [vmem:[%s268_s1 + $0x18] sm:$0xff] }
   0x3   :  { %v150_v5 = vor.u32 %v188_v3, %v147_v4  ;;  %v195_v6 = vld [vmem:[%s268_s1 + $0x28] sm:$0xff]  ;;  %v194_v7 = vld [vmem:[%s268_s1 + $0x20] sm:$0xff]  ;;  %v192_v9 = vld [vmem:[%s268_s1 + $0x10] sm:$0xff] }
   0x4   :  { %v191_v10 = vld [vmem:[%s268_s1 + $0x8] sm:$0xff]  ;;  %v190_v11 = vld [vmem:[%s268_s1] sm:$0xff] }
   0x5   :  { %187 = vmatmul.msk.bf16.vlgmr.msra.gmra.mxu1 %vm102_vm0, %v150_v5  ;;  %v145_v12 = vld [vmem:[%s269_s0] sm:$0xf]  ;;  %v189_v13 = vld [vmem:[%s269_s0 + $0x4] sm:$0xf0] }
   0x6   :  { %107 = vmatpush.bf16.msra.mxu0 %v196_v1  ;;  %v146_v14 = vor.u32 %v189_v13, %v145_v12  ;;  %v199_v15 = vld [vmem:[%s270_s2] ss:$0 sm:$0xff] }
   0xa   :  { %108 = vmatpush.bf16.msra.mxu0 %v195_v6 }
   0xe   :  { %109 = vmatpush.bf16.msra.mxu0 %v194_v7 }
  0x12   :  { %110 = vmatpush.bf16.msra.mxu0 %v193_v8 }
  0x16   :  { %111 = vmatpush.bf16.msra.mxu0 %v192_v9 }
  0x1a   :  { %112 = vmatpush.bf16.msra.mxu0 %v191_v10 }
  0x1e   :  { %113 = vmatpush.bf16.msra.mxu0 %v190_v11 }
  0x21   :  { %114 = vmatmul.bf16.vlgmr.msra.gmra.mxu0 %v146_v14 }
  0x82   :  { %v129_v16 = vpop.f32.mrf.mxu1 }
  0x8a   :  { %v131_v23 = vpop.f32.mrf.mxu1 }
  0x9e   :  { %v115_v17 = vpop.f32.mrf.mxu0 }
  0x9f   :  { %v116_v18 = vadd.f32 %v199_v15, %v115_v17 }
  0xa1   :  { %v130_v19 = vadd.f32 %v129_v16, %v116_v18 }
  0xa3   :  { %v134_v20 = vmax.f32 %v130_v19, 0.0 }
  0xa5   :  { %137 = vst.msk [vmem:[%s271_s3] sm:$0xff] %vm136_vm1, %v134_v20 }
  0xa6   :  { %v117_v21 = vpop.f32.mrf.mxu0 }
  0xa7   :  { %v118_v22 = vadd.f32 %v199_v15, %v117_v21 }
  0xa9   :  { %v132_v24 = vadd.f32 %v131_v23, %v118_v22 }
  0xab   :  { %v135_v25 = vmax.f32 %v132_v24, 0.0 }
  0xad   :  { %138 = vst.msk [vmem:[%s271_s3 + $0x8] sm:$0xff] %vm136_vm1, %v135_v25 }

// kernel: uni_backbone_fpn_forward.13
= control target key start
LH: loop header
LB: loop body
LE: loop exit
PB: predicated region body
PF: predicated region fallthrough
CT: control target
= control target key end

     0   :  { %vm182_vm0 = vcmask 261120   ;;  %vm230_vm1 = vcmask 523264   ;;  %s445_s1 = inlined_call_operand.vmem [shape: bf16[288,64], index: 1, kind: input, shape index: {}]   ;;  %s446_s0 = inlined_call_operand.vmem [shape: bf16[16,288], index: 0, kind: input, shape index: {}]   ;;  %s447_s2 = inlined_call_operand.vmem [shape: f32[1,64], index: 2, kind: input, shape index: {}]   ;;  %s448_s3 = inlined_call_operand.vmem [shape: f32[16,64], index: 3, kind: output, shape index: {}]  }
   0x1   :  { %v332_v0 = vld [vmem:[%s445_s1 + $0x38] sm:$0xff]  ;;  %v331_v2 = vld [vmem:[%s445_s1 + $0x30] sm:$0xff]  ;;  %v342_v4 = vld [vmem:[%s445_s1 + $0x88] sm:$0xff] }
   0x2   :  { %v340_v1 = vld [vmem:[%s445_s1 + $0x78] sm:$0xff]  ;;  %186 = vmatpush.bf16.msra.mxu0 %v332_v0  ;;  %v339_v3 = vld [vmem:[%s445_s1 + $0x70] sm:$0xff]  ;;  %220 = vmatpush.bf16.msra.mxu2 %v342_v4  ;;  %v341_v5 = vld [vmem:[%s445_s1 + $0x80] sm:$0xff] }
   0x3   :  { %200 = vmatpush.bf16.msra.mxu1 %v340_v1  ;;  %v247_v6 = vld [vmem:[%s446_s0 + $0x8] sm:$0xf]  ;;  %v324_v7 = vld [vmem:[%s446_s0 + $0x10] sm:$0xf0]  ;;  %v329_v11 = vld [vmem:[%s445_s1 + $0x20] sm:$0xff] }
   0x4   :  { %v330_v8 = vld [vmem:[%s445_s1 + $0x28] sm:$0xff]  ;;  %v248_v10 = vor.u32 %v324_v7, %v247_v6  ;;  %v337_v12 = vld [vmem:[%s445_s1 + $0x60] sm:$0xff]  ;;  %v328_v13 = vld [vmem:[%s445_s1 + $0x18] sm:$0xff] }
   0x5   :  { %v338_v9 = vld [vmem:[%s445_s1 + $0x68] sm:$0xff]  ;;  %v336_v14 = vld [vmem:[%s445_s1 + $0x58] sm:$0xff]  ;;  %v327_v15 = vld [vmem:[%s445_s1 + $0x10] sm:$0xff] }
   0x6   :  { %187 = vmatpush.bf16.msra.mxu0 %v331_v2  ;;  %221 = vmatpush.bf16.msra.mxu2 %v341_v5  ;;  %v335_v16 = vld [vmem:[%s445_s1 + $0x50] sm:$0xff]  ;;  %v326_v17 = vld [vmem:[%s445_s1 + $0x8] sm:$0xff]  ;;  %v325_v19 = vld [vmem:[%s445_s1] sm:$0xff] }
   0x7   :  { %201 = vmatpush.bf16.msra.mxu1 %v339_v3  ;;  %v334_v18 = vld [vmem:[%s445_s1 + $0x48] sm:$0xff]  ;;  %v333_v20 = vld [vmem:[%s445_s1 + $0x40] sm:$0xff]  ;;  %v241_v24 = vld [vmem:[%s446_s0 + $0xc] sm:$0xf0] }
   0x8   :  { %v239_v21 = vld [vmem:[%s446_s0] sm:$0xf]  ;;  %v323_v22 = vld [vmem:[%s446_s0 + $0x8] sm:$0xf0]  ;;  %v322_v23 = vld [vmem:[%s446_s0 + $0x4] sm:$0xf] }
   0x9   :  { %321 = vmatmul.msk.bf16.vlgmr.msra.gmra.mxu2 %vm182_vm0, %v248_v10  ;;  %v240_v25 = vor.u32 %v323_v22, %v239_v21  ;;  %v244_v26 = vor.u32 %v322_v23, %v241_v24  ;;  %v343_v27 = vld [vmem:[%s447_s2] ss:$0 sm:$0xff] }
   0xa   :  { %188 = vmatpush.bf16.msra.mxu0 %v330_v8 }
   0xb   :  { %202 = vmatpush.bf16.msra.mxu1 %v338_v9 }
   0xe   :  { %189 = vmatpush.bf16.msra.mxu0 %v329_v11 }
   0xf   :  { %203 = vmatpush.bf16.msra.mxu1 %v337_v12 }
  0x12   :  { %190 = vmatpush.bf16.msra.mxu0 %v328_v13 }
  0x13   :  { %204 = vmatpush.bf16.msra.mxu1 %v336_v14 }
  0x16   :  { %191 = vmatpush.bf16.msra.mxu0 %v327_v15 }
  0x17   :  { %205 = vmatpush.bf16.msra.mxu1 %v335_v16 }
  0x1a   :  { %192 = vmatpush.bf16.msra.mxu0 %v326_v17 }
  0x1b   :  { %206 = vmatpush.bf16.msra.mxu1 %v334_v18 }
  0x1e   :  { %193 = vmatpush.bf16.msra.mxu0 %v325_v19 }
  0x1f   :  { %207 = vmatpush.bf16.msra.mxu1 %v333_v20 }
  0x21   :  { %194 = vmatmul.bf16.vlgmr.msra.gmra.mxu0 %v240_v25 }
  0x22   :  { %208 = vmatmul.bf16.vlgmr.msra.gmra.mxu1 %v244_v26 }
  0x8c   :  { %v223_v31 = vpop.f32.mrf.mxu2 }
  0x94   :  { %v225_v39 = vpop.f32.mrf.mxu2 }
  0x9e   :  { %v195_v28 = vpop.f32.mrf.mxu0 }
  0x9f   :  { %v209_v29 = vpop.f32.mrf.mxu1  ;;  %v196_v30 = vadd.f32 %v343_v27, %v195_v28 }
  0xa1   :  { %v210_v32 = vadd.f32 %v209_v29, %v196_v30 }
  0xa3   :  { %v224_v33 = vadd.f32 %v223_v31, %v210_v32 }
  0xa5   :  { %v228_v34 = vmax.f32 %v224_v33, 0.0 }
  0xa6   :  { %v197_v35 = vpop.f32.mrf.mxu0 }
  0xa7   :  { %231 = vst.msk [vmem:[%s448_s3] sm:$0xff] %vm230_vm1, %v228_v34  ;;  %v198_v36 = vadd.f32 %v343_v27, %v197_v35  ;;  %v211_v37 = vpop.f32.mrf.mxu1 }
  0xa9   :  { %v212_v38 = vadd.f32 %v211_v37, %v198_v36 }
  0xab   :  { %v226_v40 = vadd.f32 %v225_v39, %v212_v38 }
  0xad   :  { %v229_v41 = vmax.f32 %v226_v40, 0.0 }
  0xaf   :  { %232 = vst.msk [vmem:[%s448_s3 + $0x8] sm:$0xff] %vm230_vm1, %v229_v41 }

// kernel: uni_backbone_fpn_forward.16
= control target key start
LH: loop header
LB: loop body
LE: loop exit
PB: predicated region body
PF: predicated region fallthrough
CT: control target
= control target key end

     0   :  { %vm58_vm0 = vcmask 523264   ;;  %vm76_vm1 = vcmask 261120   ;;  %s154_s1 = inlined_call_operand.vmem [shape: bf16[64,32], index: 1, kind: input, shape index: {}]   ;;  %s155_s2 = inlined_call_operand.vmem [shape: f32[1,32], index: 2, kind: input, shape index: {}]   ;;  %s156_s0 = inlined_call_operand.vmem [shape: bf16[16,64], index: 0, kind: input, shape index: {}]   ;;  %s157_s3 = inlined_call_operand.vmem [shape: f32[16,32], index: 3, kind: output, shape index: {}]  }
   0x1   :  { %v108_v0 = vld [vmem:[%s154_s1 + $0x18] sm:$0xff]  ;;  %v107_v1 = vld [vmem:[%s154_s1 + $0x10] sm:$0xff]  ;;  %v106_v2 = vld [vmem:[%s154_s1 + $0x8] sm:$0xff] }
   0x2   :  { %66 = vmatpush.bf16.msra.mxu0 %v108_v0  ;;  %v105_v3 = vld [vmem:[%s154_s1] sm:$0xff] }
   0x3   :  { %v104_v4 = vld [vmem:[%s156_s0] sm:$0xff] }
   0x4   :  { %v109_v5 = vld [vmem:[%s155_s2] ss:$0 sm:$0xff] }
   0x6   :  { %67 = vmatpush.bf16.msra.mxu0 %v107_v1 }
   0xa   :  { %68 = vmatpush.bf16.msra.mxu0 %v106_v2 }
   0xe   :  { %69 = vmatpush.bf16.msra.mxu0 %v105_v3 }
  0x11   :  { %103 = vmatmul.msk.bf16.vlgmr.msra.gmra.mxu0 %vm58_vm0, %v104_v4 }
  0x8e   :  { %v71_v6 = vpop.f32.mrf.mxu0 }
  0x8f   :  { %v72_v7 = vadd.f32 %v109_v5, %v71_v6 }
  0x91   :  { %77 = vst.msk [vmem:[%s157_s3] sm:$0xff] %vm76_vm1, %v72_v7 }
  0x96   :  { %v73_v8 = vpop.f32.mrf.mxu0 }
  0x97   :  { %v74_v9 = vadd.f32 %v109_v5, %v73_v8 }
  0x99   :  { %78 = vst.msk [vmem:[%s157_s3 + $0x8] sm:$0xff] %vm76_vm1, %v74_v9 }

// kernel: uni_backbone_fpn_forward.15
= control target key start
LH: loop header
LB: loop body
LE: loop exit
PB: predicated region body
PF: predicated region fallthrough
CT: control target
= control target key end

     0   :  { %vm42_vm0 = vcmask 261120   ;;  %s121_s1 = inlined_call_operand.vmem [shape: bf16[32,32], index: 1, kind: input, shape index: {}]   ;;  %s122_s2 = inlined_call_operand.vmem [shape: f32[1,32], index: 2, kind: input, shape index: {}]   ;;  %s123_s0 = inlined_call_operand.vmem [shape: bf16[16,32], index: 0, kind: input, shape index: {}]   ;;  %s124_s3 = inlined_call_operand.vmem [shape: f32[16,32], index: 3, kind: output, shape index: {}]  }
   0x1   :  { %v81_v0 = vld [vmem:[%s121_s1 + $0x8] sm:$0xff]  ;;  %v80_v1 = vld [vmem:[%s121_s1] sm:$0xff] }
   0x2   :  { %52 = vmatpush.bf16.msra.mxu0 %v81_v0  ;;  %v79_v2 = vld [vmem:[%s123_s0] sm:$0xff] }
   0x3   :  { %v82_v3 = vld [vmem:[%s122_s2] ss:$0 sm:$0xff] }
   0x6   :  { %53 = vmatpush.bf16.msra.mxu0 %v80_v1 }
   0x9   :  { %78 = vmatmul.msk.bf16.vlgmr.msra.gmra.mxu0 %vm42_vm0, %v79_v2 }
  0x86   :  { %v55_v4 = vpop.f32.mrf.mxu0 }
  0x87   :  { %v56_v5 = vadd.f32 %v82_v3, %v55_v4 }
  0x89   :  { %60 = vst.msk [vmem:[%s124_s3] sm:$0xff] %vm42_vm0, %v56_v5 }
  0x8e   :  { %v57_v6 = vpop.f32.mrf.mxu0 }
  0x8f   :  { %v58_v7 = vadd.f32 %v82_v3, %v57_v6 }
  0x91   :  { %61 = vst.msk [vmem:[%s124_s3 + $0x8] sm:$0xff] %vm42_vm0, %v58_v7 }

// kernel: uni_backbone_fpn_forward.17
= control target key start
LH: loop header
LB: loop body
LE: loop exit
PB: predicated region body
PF: predicated region fallthrough
CT: control target
= control target key end

     0   :  { %s43_s0 = inlined_call_operand.vmem [shape: f32[8,128], index: 0, kind: input, shape index: {}]   ;;  %s44_s1 = inlined_call_operand.vmem [shape: f32[8,128], index: 1, kind: input, shape index: {}]   ;;  %s45_s2 = inlined_call_operand.vmem [shape: f32[8,128], index: 2, kind: output, shape index: {}]  }
   0x1   :  { %v11_v0 = vld [vmem:[%s43_s0] sm:$0xff] }
   0x2   :  { %v12_v1 = vld [vmem:[%s44_s1] sm:$0xff] }
   0x3   :  { %v13_v2 = vadd.f32 %v12_v1, %v11_v0 }
   0x5   :  { %14 = vst [vmem:[%s45_s2] sm:$0xff] %v13_v2 }

// kernel: uni_backbone_fpn_forward.14
= control target key start
LH: loop header
LB: loop body
LE: loop exit
PB: predicated region body
PF: predicated region fallthrough
CT: control target
= control target key end

     0   :  { %vm41_vm0 = vcmask 130048   ;;  %vm67_vm1 = vcmask 261120   ;;  %s139_s1 = inlined_call_operand.vmem [shape: bf16[16,32], index: 1, kind: input, shape index: {}]   ;;  %s140_s0 = inlined_call_operand.vmem [shape: bf16[32,16], index: 0, kind: input, shape index: {}]   ;;  %s141_s2 = inlined_call_operand.vmem [shape: f32[1,32], index: 2, kind: input, shape index: {}]   ;;  %s142_s3 = inlined_call_operand.vmem [shape: f32[32,32], index: 3, kind: output, shape index: {}]  }
   0x1   :  { %v92_v0 = vld [vmem:[%s139_s1] sm:$0xff]  ;;  %v91_v2 = vld [vmem:[%s140_s0 + $0x8] sm:$0xff] }
   0x2   :  { %v90_v1 = vld [vmem:[%s140_s0] sm:$0xff]  ;;  %55 = vmatpush.bf16.msra.mxu0 %v92_v0  ;;  %93 = vmatpush.bf16.msra.mxu1 %v92_v0 }
   0x3   :  { %v94_v3 = vld [vmem:[%s141_s2] ss:$0 sm:$0xff] }
   0x5   :  { %88 = vmatmul.msk.bf16.vlgmr.msra.gmra.mxu0 %vm41_vm0, %v90_v1  ;;  %89 = vmatmul.msk.bf16.vlgmr.msra.gmra.mxu1 %vm41_vm0, %v91_v2 }
  0x82   :  { %v57_v4 = vpop.f32.mrf.mxu0  ;;  %v62_v5 = vpop.f32.mrf.mxu1 }
  0x83   :  { %v58_v6 = vadd.f32 %v94_v3, %v57_v4  ;;  %v63_v7 = vadd.f32 %v94_v3, %v62_v5 }
  0x85   :  { %68 = vst.msk [vmem:[%s142_s3] sm:$0xff] %vm67_vm1, %v58_v6 }
  0x86   :  { %70 = vst.msk [vmem:[%s142_s3 + $0x10] sm:$0xff] %vm67_vm1, %v63_v7 }
  0x8a   :  { %v59_v8 = vpop.f32.mrf.mxu0  ;;  %v64_v9 = vpop.f32.mrf.mxu1 }
  0x8b   :  { %v60_v10 = vadd.f32 %v94_v3, %v59_v8  ;;  %v65_v11 = vadd.f32 %v94_v3, %v64_v9 }
  0x8d   :  { %69 = vst.msk [vmem:[%s142_s3 + $0x8] sm:$0xff] %vm67_vm1, %v60_v10 }
  0x8e   :  { %71 = vst.msk [vmem:[%s142_s3 + $0x18] sm:$0xff] %vm67_vm1, %v65_v11 }

// kernel: uni_backbone_fpn_forward.19
= control target key start
LH: loop header
LB: loop body
LE: loop exit
PB: predicated region body
PF: predicated region fallthrough
CT: control target
= control target key end

     0   :  { %vm202_vm0 = vcmask 261120   ;;  %s577_s0 = inlined_call_operand.vmem [shape: bf16[32,288], index: 0, kind: input, shape index: {}]   ;;  %s578_s1 = inlined_call_operand.vmem [shape: bf16[288,32], index: 1, kind: input, shape index: {}]   ;;  %s579_s2 = inlined_call_operand.vmem [shape: f32[1,32], index: 2, kind: input, shape index: {}]   ;;  %s580_s3 = inlined_call_operand.hbm [shape: f32[32,32], index: 3, kind: output, shape index: {}]  }
   0x1   :  { %v403_v0 = vld [vmem:[%s578_s1 + $0x38] sm:$0xff]  ;;  %v402_v2 = vld [vmem:[%s578_s1 + $0x30] sm:$0xff]  ;;  %v413_v3 = vld [vmem:[%s578_s1 + $0x88] sm:$0xff] }
   0x2   :  { %v411_v1 = vld [vmem:[%s578_s1 + $0x78] sm:$0xff]  ;;  %209 = vmatpush.bf16.msra.mxu0 %v403_v0  ;;  %414 = vmatpush.bf16.msra.mxu3 %v403_v0  ;;  %v410_v4 = vld [vmem:[%s578_s1 + $0x70] sm:$0xff]  ;;  %v412_v5 = vld [vmem:[%s578_s1 + $0x80] sm:$0xff] }
   0x3   :  { %228 = vmatpush.bf16.msra.mxu1 %v411_v1  ;;  %253 = vmatpush.bf16.msra.mxu2 %v413_v3  ;;  %v302_v6 = vld [vmem:[%s577_s0 + $0x8] sm:$0xf]  ;;  %v392_v7 = vld [vmem:[%s577_s0 + $0x10] sm:$0xf0]  ;;  %v400_v11 = vld [vmem:[%s578_s1 + $0x20] sm:$0xff] }
   0x4   :  { %v401_v8 = vld [vmem:[%s578_s1 + $0x28] sm:$0xff]  ;;  %v303_v10 = vor.u32 %v392_v7, %v302_v6 }
   0x5   :  { %v409_v9 = vld [vmem:[%s578_s1 + $0x68] sm:$0xff] }
   0x6   :  { %210 = vmatpush.bf16.msra.mxu0 %v402_v2  ;;  %415 = vmatpush.bf16.msra.mxu3 %v402_v2 }
   0x7   :  { %229 = vmatpush.bf16.msra.mxu1 %v410_v4  ;;  %254 = vmatpush.bf16.msra.mxu2 %v412_v5 }
   0xa   :  { %211 = vmatpush.bf16.msra.mxu0 %v401_v8  ;;  %416 = vmatpush.bf16.msra.mxu3 %v401_v8 }
   0xb   :  { %8 = vsyncpa [#allocation3], 0  ;;  %230 = vmatpush.bf16.msra.mxu1 %v409_v9  ;;  %v408_v12 = vld [vmem:[%s578_s1 + $0x60] sm:$0xff]  ;;  %388 = vmatmul.msk.bf16.vlgmr.msra.gmra.mxu2 %vm202_vm0, %v303_v10  ;;  %v399_v13 = vld [vmem:[%s578_s1 + $0x18] sm:$0xff]  ;;  %s280_s21 = sshll.u32 %s580_s3, 4  ;;  %s453_s22 = smov 128   ;;  %s281_s21 = int_to_ptr.hbm [resolvable:$true] %s280_s21 }
   0xc   :  { %v407_v14 = vld [vmem:[%s578_s1 + $0x58] sm:$0xff]  ;;  %v398_v15 = vld [vmem:[%s578_s1 + $0x10] sm:$0xff]  ;;  %v314_v17 = vld [vmem:[%s577_s0 + $0x20] sm:$0xf]  ;;  %s454_s23 = smov 8  }
   0xd   :  { %v406_v16 = vld [vmem:[%s578_s1 + $0x50] sm:$0xff]  ;;  %v395_v18 = vld [vmem:[%s577_s0 + $0x28] sm:$0xf0]  ;;  %v396_v22 = vld [vmem:[%s578_s1] sm:$0xff] }
   0xe   :  { %212 = vmatpush.bf16.msra.mxu0 %v400_v11  ;;  %417 = vmatpush.bf16.msra.mxu3 %v400_v11  ;;  %v397_v19 = vld [vmem:[%s578_s1 + $0x8] sm:$0xff]  ;;  %v315_v21 = vor.u32 %v395_v18, %v314_v17  ;;  %v294_v23 = vld [vmem:[%s577_s0] sm:$0xf]  ;;  %v306_v25 = vld [vmem:[%s577_s0 + $0x18] sm:$0xf] }
   0xf   :  { %231 = vmatpush.bf16.msra.mxu1 %v408_v12  ;;  %v405_v20 = vld [vmem:[%s578_s1 + $0x48] sm:$0xff]  ;;  %v394_v26 = vld [vmem:[%s577_s0 + $0x20] sm:$0xf0]  ;;  %v296_v29 = vld [vmem:[%s577_s0 + $0xc] sm:$0xf0] }
  0x10   :  { %v391_v24 = vld [vmem:[%s577_s0 + $0x8] sm:$0xf0]  ;;  %v404_v27 = vld [vmem:[%s578_s1 + $0x40] sm:$0xff]  ;;  %v307_v31 = vor.u32 %v394_v26, %v306_v25  ;;  %v393_v33 = vld [vmem:[%s577_s0 + $0x1c] sm:$0xf] }
  0x11   :  { %v390_v28 = vld [vmem:[%s577_s0 + $0x4] sm:$0xf]  ;;  %v295_v30 = vor.u32 %v391_v24, %v294_v23  ;;  %v308_v34 = vld [vmem:[%s577_s0 + $0x24] sm:$0xf0]  ;;  %v425_v37 = vld [vmem:[%s579_s2] ss:$0 sm:$0xff] }
  0x12   :  { %213 = vmatpush.bf16.msra.mxu0 %v399_v13  ;;  %418 = vmatpush.bf16.msra.mxu3 %v399_v13  ;;  %v299_v32 = vor.u32 %v390_v28, %v296_v29  ;;  %v311_v35 = vor.u32 %v393_v33, %v308_v34  ;;  %s452_s0 = smov [#allocation2]  }
  0x13   :  { %232 = vmatpush.bf16.msra.mxu1 %v407_v14  ;;  %s278_s2 = sshll.u32 %s452_s0, 4  ;;  %s279_s2 = int_to_ptr.vmem [resolvable:$true] %s278_s2 }
  0x16   :  { %214 = vmatpush.bf16.msra.mxu0 %v398_v15  ;;  %419 = vmatpush.bf16.msra.mxu3 %v398_v15 }
  0x17   :  { %233 = vmatpush.bf16.msra.mxu1 %v406_v16 }
  0x1a   :  { %215 = vmatpush.bf16.msra.mxu0 %v397_v19  ;;  %420 = vmatpush.bf16.msra.mxu3 %v397_v19 }
  0x1b   :  { %234 = vmatpush.bf16.msra.mxu1 %v405_v20  ;;  %389 = vmatmul.msk.bf16.gmra.mxu2 %vm202_vm0, %v315_v21 }
  0x1e   :  { %216 = vmatpush.bf16.msra.mxu0 %v396_v22  ;;  %421 = vmatpush.bf16.msra.mxu3 %v396_v22 }
  0x1f   :  { %235 = vmatpush.bf16.msra.mxu1 %v404_v27 }
  0x21   :  { %217 = vmatmul.bf16.vlgmr.msra.gmra.mxu0 %v295_v30  ;;  %222 = vmatmul.bf16.vlgmr.msra.gmra.mxu3 %v307_v31 }
  0x22   :  { %236 = vmatmul.bf16.vlgmr.msra.gmra.mxu1 %v299_v32 }
  0x32   :  { %241 = vmatmul.bf16.gmra.mxu1 %v311_v35 }
  0x8e   :  { %v256_v36 = vpop.f32.mrf.mxu2 }
  0x96   :  { %v258_v44 = vpop.f32.mrf.mxu2 }
  0x9e   :  { %v218_v38 = vpop.f32.mrf.mxu0  ;;  %v261_v53 = vpop.f32.mrf.mxu2 }
  0x9f   :  { %v219_v39 = vadd.f32 %v425_v37, %v218_v38  ;;  %v237_v40 = vpop.f32.mrf.mxu1 }
  0xa1   :  { %v238_v41 = vadd.f32 %v237_v40, %v219_v39 }
  0xa3   :  { %v257_v42 = vadd.f32 %v256_v36, %v238_v41 }
  0xa4   :  { %v223_v48 = vpop.f32.mrf.mxu3 }
  0xa5   :  { %v266_v43 = vmax.f32 %v257_v42, 0.0  ;;  %v224_v51 = vadd.f32 %v425_v37, %v223_v48 }
  0xa6   :  { %v220_v45 = vpop.f32.mrf.mxu0  ;;  %v263_v62 = vpop.f32.mrf.mxu2 }
  0xa7   :  { %270 = vst.msk [vmem:[#allocation2] sm:$0xff] %vm202_vm0, %v266_v43  ;;  %v221_v46 = vadd.f32 %v425_v37, %v220_v45  ;;  %v239_v47 = vpop.f32.mrf.mxu1 }
  0xa9   :  { %v240_v49 = vadd.f32 %v239_v47, %v221_v46 }
  0xab   :  { %v259_v50 = vadd.f32 %v258_v44, %v240_v49 }
  0xac   :  { %v225_v57 = vpop.f32.mrf.mxu3 }
  0xad   :  { %v267_v52 = vmax.f32 %v259_v50, 0.0  ;;  %v226_v59 = vadd.f32 %v425_v37, %v225_v57 }
  0xaf   :  { %271 = vst.msk [vmem:[#allocation2 + $0x8] sm:$0xff] %vm202_vm0, %v267_v52  ;;  %v242_v54 = vpop.f32.mrf.mxu1 }
  0xb0   :  { %v243_v55 = vadd.f32 %v242_v54, %v224_v51 }
  0xb2   :  { %v262_v56 = vadd.f32 %v261_v53, %v243_v55 }
  0xb4   :  { %v268_v58 = vmax.f32 %v262_v56, 0.0 }
  0xb6   :  { %272 = vst.msk [vmem:[#allocation2 + $0x10] sm:$0xff] %vm202_vm0, %v268_v58 }
  0xb7   :  { %v244_v60 = vpop.f32.mrf.mxu1 }
  0xb8   :  { %v245_v61 = vadd.f32 %v244_v60, %v226_v59 }
  0xba   :  { %v264_v63 = vadd.f32 %v263_v62, %v245_v61 }
  0xbc   :  { %v269_v0 = vmax.f32 %v264_v63, 0.0 }
  0xbe   :  { %273 = vst.msk [vmem:[#allocation2 + $0x18] sm:$0xff] %vm202_vm0, %v269_v0 }
  0xbf   :  { %286 = dma.vmem_to_hbm [thread:$0]  %s279_s2, 512, %s281_s21, [#allocation3], %s453_s22, %s453_s22, %s454_s23  }
  0xc0   :  { %450 = dma.done.wait [#allocation3], 512  }
  0xc1   :  { %451 = vsyncadd [#allocation3], 4294966784 }
  0xc2   :  { %291 = vsyncpa [#allocation3], 1 }

</bundles_post_ra>
